<compile_context>
chip_gen: v7x
topology: tpu7x:2x2x1
jax: 0.10.0
libtpu: 0.0.40
codegen_flags: <defaults>
</compile_context>

<pallas_src>
import functools
import math

import jax
import jax.numpy as jnp
from jax.experimental import pallas as pl
from jax.experimental.pallas import tpu as pltpu

LANE = 128  # TPU lane width: last-dim alignment target


def _round_up(n, m):
    return ((n + m - 1) // m) * m


def _mlp_kernel(x_ref, w1_ref, b1_ref, w2_ref, b2_ref, w3_ref, b3_ref, o_ref):
    # Whole forward pass for one batch tile; all operands resident in VMEM.
    # x arrives fp32 (single HBM read) and is cast to the compute dtype here.
    x = x_ref[...].astype(w1_ref.dtype)
    h1 = jnp.dot(x, w1_ref[...], preferred_element_type=jnp.float32) + b1_ref[...]
    h1 = jnp.maximum(h1, 0.0).astype(w2_ref.dtype)
    h2 = jnp.dot(h1, w2_ref[...], preferred_element_type=jnp.float32) + b2_ref[...]
    h2 = jnp.maximum(h2, 0.0)
    # Layer 3: (bm, p2) * (1, p2) broadcast multiply (VPU) + lane reduction (XLU)
    # against the fp32 w3 row -> narrow (bm, 1) output directly.
    out = jnp.sum(h2 * w3_ref[...], axis=-1, keepdims=True) + b3_ref[...]
    o_ref[...] = out.astype(o_ref.dtype)


def prepare_params(params, compute_dtype=jnp.bfloat16):
    """Pad hidden dims to the 128-lane boundary and cast once (hoisted out of the
    per-call path). Zero padding is exact: ReLU(0 + 0) = 0 and zero weight
    rows/cols contribute nothing. Returns
      (w1 [ctx,p1] bf16, b1 [1,p1] f32, w2 [p1,p2] bf16, b2 [1,p2] f32,
       w3_row [1,p2] f32, b3 [1,1] f32).
    """
    w1, b1, w2, b2, w3, b3 = params
    d1, d2 = w1.shape[1], w2.shape[1]
    p1, p2 = _round_up(d1, LANE), _round_up(d2, LANE)
    w1p = jnp.pad(w1, ((0, 0), (0, p1 - d1))).astype(compute_dtype)
    b1p = jnp.pad(b1.reshape(1, -1), ((0, 0), (0, p1 - d1))).astype(jnp.float32)
    w2p = jnp.pad(w2, ((0, p1 - d1), (0, p2 - d2))).astype(compute_dtype)
    b2p = jnp.pad(b2.reshape(1, -1), ((0, 0), (0, p2 - d2))).astype(jnp.float32)
    # Third layer kept as an fp32 row for the in-kernel VPU dot-product.
    w3row = jnp.pad(w3.reshape(1, -1), ((0, 0), (0, p2 - d2))).astype(jnp.float32)
    b3p = b3.reshape(1, 1).astype(jnp.float32)
    return (w1p, b1p, w2p, b2p, w3row, b3p)


def _dense_forward(x, prepped):
    """Small-batch fallback using the *same* padded/low-precision math as the
    kernel, so scores do not depend on how contexts were batched."""
    w1, b1, w2, b2, w3row, b3 = prepped
    h1 = jnp.dot(x.astype(w1.dtype), w1, preferred_element_type=jnp.float32) + b1
    h1 = jnp.maximum(h1, 0.0).astype(w2.dtype)
    h2 = jnp.dot(h1, w2, preferred_element_type=jnp.float32) + b2
    h2 = jnp.maximum(h2, 0.0)
    return jnp.sum(h2 * w3row, axis=-1, keepdims=True) + b3


def reference_forward(x, params):
    """Pure fp32 reference matching the PyTorch module exactly."""
    w1, b1, w2, b2, w3, b3 = params
    h1 = jnp.maximum(x @ w1 + b1, 0.0)
    h2 = jnp.maximum(h1 @ w2 + b2, 0.0)
    return h2 @ w3 + b3


@functools.partial(jax.jit, static_argnames=("block_m", "force_pallas"))
def neural_network_forward(x, prepped, block_m=1024, force_pallas=False):
    """Forward pass. `prepped` comes from prepare_params(params) (computed once).

    block_m: max batch tile (sweep 512-4096; kept a multiple of 128).
    Output: (batch, 1) fp32.
    """
    w1, b1, w2, b2, w3row, b3 = prepped
    batch, ctx = x.shape
    p1, p2 = w1.shape[1], w2.shape[1]

    # Small-batch fast path: a Pallas launch is pure overhead below ~1 tile.
    if not force_pallas and batch < LANE:
        return _dense_forward(x, prepped)

    # Large tiles amortize the ~0.35us per-grid-step overhead, but cap bm at
    # ceil(batch/2) rounded to 128 so the parallel grid has >=2 steps and both
    # v7x TensorCores are used (harmless no-op on single-TC v5e/v6e).
    bm = min(block_m, max(LANE, _round_up(-(-batch // 2), LANE)))
    grid = (pl.cdiv(batch, bm),)

    out = pl.pallas_call(
        _mlp_kernel,
        out_shape=jax.ShapeDtypeStruct((batch, 1), jnp.float32),
        grid=grid,
        in_specs=[
            pl.BlockSpec((bm, ctx), lambda i: (i, 0)),   # x tile: only moving operand
            pl.BlockSpec((ctx, p1), lambda i: (0, 0)),   # w1 (resident)
            pl.BlockSpec((1, p1), lambda i: (0, 0)),     # b1
            pl.BlockSpec((p1, p2), lambda i: (0, 0)),    # w2
            pl.BlockSpec((1, p2), lambda i: (0, 0)),     # b2
            pl.BlockSpec((1, p2), lambda i: (0, 0)),     # w3 row (fp32)
            pl.BlockSpec((1, 1), lambda i: (0, 0)),      # b3
        ],
        out_specs=pl.BlockSpec((bm, 1), lambda i: (i, 0)),  # narrow (bm, 1) store
        compiler_params=pltpu.CompilerParams(
            dimension_semantics=("parallel",)
        ),
    )(x, w1, b1, w2, b2, w3row, b3)
    return out


def init_params(key, context_dim, hidden_dims=(100, 50)):
    """Deterministic init mimicking nn.Linear default: U(-1/sqrt(fan_in), 1/sqrt(fan_in))."""
    dims = [context_dim, *hidden_dims, 1]
    params = []
    for i in range(len(dims) - 1):
        fan_in, fan_out = dims[i], dims[i + 1]
        key, kw, kb = jax.random.split(key, 3)
        bound = 1.0 / math.sqrt(fan_in)
        # Stored as [in, out] (transpose of PyTorch's [out, in]) for x @ W.
        w = jax.random.uniform(kw, (fan_in, fan_out), jnp.float32, -bound, bound)
        b = jax.random.uniform(kb, (1, fan_out), jnp.float32, -bound, bound)
        params.extend([w, b])
    return tuple(params)


if __name__ == "__main__":
    key = jax.random.PRNGKey(0)
    k_x, k_p = jax.random.split(key)

    batch, context_dim = 256, 32  # 2 grid steps (bm capped at ceil(batch/2)=128)
    x = jax.random.normal(k_x, (batch, context_dim), jnp.float32)
    params = init_params(k_p, context_dim, hidden_dims=(100, 50))

    ref = reference_forward(x, params)

    # Prepare (pad + cast) parameters once, outside the per-call path.
    prepped_bf16 = prepare_params(params, compute_dtype=jnp.bfloat16)
    out = neural_network_forward(x, prepped_bf16)
    out = jax.block_until_ready(out)
    assert out.shape == (batch, 1), out.shape
    assert bool(jnp.allclose(out, ref, atol=3e-2, rtol=3e-2)), "bf16 path mismatch"

    # fp32 compute path through the same kernel (tighter tolerance).
    prepped_f32 = prepare_params(params, compute_dtype=jnp.float32)
    out_f32 = neural_network_forward(x, prepped_f32)
    out_f32 = jax.block_until_ready(out_f32)
    assert bool(jnp.allclose(out_f32, ref, atol=1e-4, rtol=1e-4)), "fp32 path mismatch"

    # Small-batch fallback uses identical padded/bf16 math (consistent numerics).
    x_small = x[:16]
    out_small = jax.block_until_ready(neural_network_forward(x_small, prepped_bf16))
    assert bool(jnp.allclose(out_small, out[:16], atol=3e-3, rtol=3e-3)), "fallback mismatch"

    print("KERNEL_OK")
</pallas_src>

<mosaic_0001>
module attributes {stable_mosaic.version = 11 : i64} {
  func.func @_mlp_kernel(%arg0: i32, %arg1: memref<128x32xf32, #tpu.memory_space<vmem>>, %arg2: memref<32x128xbf16, #tpu.memory_space<vmem>>, %arg3: memref<1x128xf32, #tpu.memory_space<vmem>>, %arg4: memref<128x128xbf16, #tpu.memory_space<vmem>>, %arg5: memref<1x128xf32, #tpu.memory_space<vmem>>, %arg6: memref<1x128xf32, #tpu.memory_space<vmem>>, %arg7: memref<1x1xf32, #tpu.memory_space<vmem>>, %arg8: memref<128x1xf32, #tpu.memory_space<vmem>>) attributes {dimension_semantics = [#tpu.dimension_semantics<parallel>], iteration_bounds = array<i64: 2>, scalar_prefetch = 0 : i64, scratch_operands = 0 : i64, tpu.core_type = #tpu.core_type<tc>, window_params = [{transform_indices = @transform_0, window_bounds = array<i64: 128, 32>}, {pipeline_mode = #tpu.pipeline_mode<synchronous>, transform_indices = @transform_1, window_bounds = array<i64: 32, 128>}, {pipeline_mode = #tpu.pipeline_mode<synchronous>, transform_indices = @transform_2, window_bounds = array<i64: 1, 128>}, {pipeline_mode = #tpu.pipeline_mode<synchronous>, transform_indices = @transform_3, window_bounds = array<i64: 128, 128>}, {pipeline_mode = #tpu.pipeline_mode<synchronous>, transform_indices = @transform_4, window_bounds = array<i64: 1, 128>}, {pipeline_mode = #tpu.pipeline_mode<synchronous>, transform_indices = @transform_5, window_bounds = array<i64: 1, 128>}, {pipeline_mode = #tpu.pipeline_mode<synchronous>, transform_indices = @transform_6, window_bounds = array<i64: 1, 1>}, {transform_indices = @transform_7, window_bounds = array<i64: 128, 1>}]} {
    %c0 = arith.constant 0 : index
    %c0_0 = arith.constant 0 : index
    %0 = vector.load %arg1[%c0, %c0_0] : memref<128x32xf32, #tpu.memory_space<vmem>>, vector<128x32xf32>
    %1 = arith.truncf %0 : vector<128x32xf32> to vector<128x32xbf16>
    %c0_1 = arith.constant 0 : index
    %c0_2 = arith.constant 0 : index
    %2 = vector.load %arg2[%c0_1, %c0_2] : memref<32x128xbf16, #tpu.memory_space<vmem>>, vector<32x128xbf16>
    %cst = arith.constant dense<0.000000e+00> : vector<128x128xf32>
    %3 = tpu.matmul %1, %2, %cst {dimension_numbers = #tpu.dot_dimension_numbers<[1], [0], [0], [1], [0, 0, 1, 1], [], []>} : vector<128x32xbf16>, vector<32x128xbf16>, vector<128x128xf32> -> vector<128x128xf32>
    %c0_3 = arith.constant 0 : index
    %c0_4 = arith.constant 0 : index
    %4 = vector.load %arg3[%c0_3, %c0_4] : memref<1x128xf32, #tpu.memory_space<vmem>>, vector<1x128xf32>
    %5 = vector.broadcast %4 : vector<1x128xf32> to vector<128x128xf32>
    %6 = arith.addf %3, %5 : vector<128x128xf32>
    %cst_5 = arith.constant 0.000000e+00 : f32
    %7 = vector.broadcast %cst_5 : f32 to vector<128x128xf32>
    %8 = arith.maximumf %6, %7 : vector<128x128xf32>
    %9 = arith.truncf %8 : vector<128x128xf32> to vector<128x128xbf16>
    %c0_6 = arith.constant 0 : index
    %c0_7 = arith.constant 0 : index
    %10 = vector.load %arg4[%c0_6, %c0_7] : memref<128x128xbf16, #tpu.memory_space<vmem>>, vector<128x128xbf16>
    %cst_8 = arith.constant dense<0.000000e+00> : vector<128x128xf32>
    %11 = tpu.matmul %9, %10, %cst_8 {dimension_numbers = #tpu.dot_dimension_numbers<[1], [0], [0], [1], [0, 0, 1, 1], [], []>} : vector<128x128xbf16>, vector<128x128xbf16>, vector<128x128xf32> -> vector<128x128xf32>
    %c0_9 = arith.constant 0 : index
    %c0_10 = arith.constant 0 : index
    %12 = vector.load %arg5[%c0_9, %c0_10] : memref<1x128xf32, #tpu.memory_space<vmem>>, vector<1x128xf32>
    %13 = vector.broadcast %12 : vector<1x128xf32> to vector<128x128xf32>
    %14 = arith.addf %11, %13 : vector<128x128xf32>
    %cst_11 = arith.constant 0.000000e+00 : f32
    %15 = vector.broadcast %cst_11 : f32 to vector<128x128xf32>
    %16 = arith.maximumf %14, %15 : vector<128x128xf32>
    %c0_12 = arith.constant 0 : index
    %c0_13 = arith.constant 0 : index
    %17 = vector.load %arg6[%c0_12, %c0_13] : memref<1x128xf32, #tpu.memory_space<vmem>>, vector<1x128xf32>
    %18 = vector.broadcast %17 : vector<1x128xf32> to vector<128x128xf32>
    %19 = arith.mulf %16, %18 : vector<128x128xf32>
    %cst_14 = arith.constant dense<0.000000e+00> : vector<128xf32>
    %20 = vector.multi_reduction <add>, %19, %cst_14 [1] : vector<128x128xf32> to vector<128xf32>
    %21 = vector.shape_cast %20 : vector<128xf32> to vector<128x1xf32>
    %c0_15 = arith.constant 0 : index
    %c0_16 = arith.constant 0 : index
    %22 = vector.load %arg7[%c0_15, %c0_16] : memref<1x1xf32, #tpu.memory_space<vmem>>, vector<1x1xf32>
    %23 = vector.broadcast %22 : vector<1x1xf32> to vector<128x1xf32>
    %24 = arith.addf %21, %23 : vector<128x1xf32>
    %c0_17 = arith.constant 0 : index
    %c0_18 = arith.constant 0 : index
    %25 = vector.load %arg8[%c0_17, %c0_18] : memref<128x1xf32, #tpu.memory_space<vmem>>, vector<128x1xf32>
    tpu.vector_store %arg8[%c0_17, %c0_18], %24 {strides = array<i32>} : memref<128x1xf32, #tpu.memory_space<vmem>>, vector<128x1xf32>,
    return
  }
  func.func @transform_0(%arg0: i32) -> (i32, i32) {
    %c0_i32 = arith.constant 0 : i32
    %c0_i32_0 = arith.constant 0 : i32
    return %arg0, %c0_i32 : i32, i32
  }
  func.func @transform_1(%arg0: i32) -> (i32, i32) {
    %c0_i32 = arith.constant 0 : i32
    %c0_i32_0 = arith.constant 0 : i32
    %c0_i32_1 = arith.constant 0 : i32
    return %c0_i32, %c0_i32_0 : i32, i32
  }
  func.func @transform_2(%arg0: i32) -> (i32, i32) {
    %c0_i32 = arith.constant 0 : i32
    %c0_i32_0 = arith.constant 0 : i32
    %c0_i32_1 = arith.constant 0 : i32
    return %c0_i32, %c0_i32_0 : i32, i32
  }
  func.func @transform_3(%arg0: i32) -> (i32, i32) {
    %c0_i32 = arith.constant 0 : i32
    %c0_i32_0 = arith.constant 0 : i32
    %c0_i32_1 = arith.constant 0 : i32
    return %c0_i32, %c0_i32_0 : i32, i32
  }
  func.func @transform_4(%arg0: i32) -> (i32, i32) {
    %c0_i32 = arith.constant 0 : i32
    %c0_i32_0 = arith.constant 0 : i32
    %c0_i32_1 = arith.constant 0 : i32
    return %c0_i32, %c0_i32_0 : i32, i32
  }
  func.func @transform_5(%arg0: i32) -> (i32, i32) {
    %c0_i32 = arith.constant 0 : i32
    %c0_i32_0 = arith.constant 0 : i32
    %c0_i32_1 = arith.constant 0 : i32
    return %c0_i32, %c0_i32_0 : i32, i32
  }
  func.func @transform_6(%arg0: i32) -> (i32, i32) {
    %c0_i32 = arith.constant 0 : i32
    %c0_i32_0 = arith.constant 0 : i32
    %c0_i32_1 = arith.constant 0 : i32
    return %c0_i32, %c0_i32_0 : i32, i32
  }
  func.func @transform_7(%arg0: i32) -> (i32, i32) {
    %c0_i32 = arith.constant 0 : i32
    %c0_i32_0 = arith.constant 0 : i32
    return %arg0, %c0_i32 : i32, i32
  }
}

</mosaic_0001>

<bundles_post_ra>
// kernel: neural_network_forward.1
= control target key start
LH: loop header
LB: loop body
LE: loop exit
PB: predicated region body
PF: predicated region fallthrough
CT: control target
= control target key end

     0   :  { %s1009_s26 = smov 0   ;;  %s1168_s0 = inlined_call_operand.vmem [shape: f32[256,32], index: 0, kind: input, shape index: {}]   ;;  %s1169_s1 = inlined_call_operand.vmem [shape: bf16[32,128], index: 1, kind: input, shape index: {}]   ;;  %s1170_s2 = inlined_call_operand.vmem [shape: f32[1,128], index: 2, kind: input, shape index: {}]   ;;  %s1171_s3 = inlined_call_operand.vmem [shape: bf16[128,128], index: 3, kind: input, shape index: {}]   ;;  %s1172_s4 = inlined_call_operand.vmem [shape: f32[1,128], index: 4, kind: input, shape index: {}]   ;;  %s1173_s5 = inlined_call_operand.vmem [shape: f32[1,128], index: 5, kind: input, shape index: {}]   ;;  %s1174_s6 = inlined_call_operand.<no memory space> [shape: f32[1,1], index: 6, kind: input, shape index: {}]   ;;  %s1175_s7 = inlined_call_operand.vmem [shape: f32[256,1], index: 7, kind: output, shape index: {}]  }
   0x1   :  { %v12_v0 = vstv %s1174_s6 }
   0x2   :  { %13 = vst [vmem:[#allocation2] sm:$0x1] %v12_v0 }
   0x3 LB: > { %s813_s27 = sadd.s32 4294967295, %s964_s26   ;;  %p817_p0 = scmp.ge.s32.totalorder %s964_s26, 1  ;;  %s964_s26 = sphi %s1009_s26, %s19_s26  }
   0x4   : > { %p240_p1 = scmp.lt.s32.totalorder %s964_s26, 3 }
   0x6   : > { %p241_p2 = pnand %p817_p0, %p240_p1 }
   0x7   : > { %v948_v1 = vld [vmem:[%s1169_s1] sm:$0xff] (!%p241_p2)   ;;  %s818_s6 = sshll.u32 (!%p241_p2), %s813_s27, 4  ;;  %v949_v2 = vld [vmem:[%s1169_s1 + $0x8] sm:$0xff] (!%p241_p2)   ;;  %v952_v5 = vld [vmem:[%s1171_s3 + $0x10] sm:$0xff] (!%p241_p2)   ;;  %vm332_vm0 = vcmask (!%p241_p2), 261120   ;;  %vm740_vm1 = vcmask (!%p241_p2), 7168  }
   0x8   : > { %244 = sbr.rel (%p241_p2) target bundleno = 638 (0x27e), region = 48  ;;  %p273_p3 = scmp.lt.s32.totalorder (!%p241_p2), %s818_s6, 31  ;;  %872 = vmatprep.subr.bf16.mxu0 (!%p241_p2), %v948_v1  ;;  %v950_v3 = vld [vmem:[%s1171_s3] sm:$0xff] (!%p241_p2)   ;;  %v951_v4 = vld [vmem:[%s1171_s3 + $0x8] sm:$0xff] (!%p241_p2)   ;;  %v953_v17 = vld [vmem:[%s1171_s3 + $0x18] sm:$0xff] (!%p241_p2)  }
   0x9   : > { %873 = vmatpush3.bf16.msra.mxu0 (!%p241_p2), %v948_v1  ;;  %924 = vmatprep.subr.bf16.mxu1 (!%p241_p2), %v950_v3  ;;  %v954_v22 = vld [vmem:[%s1171_s3 + $0x20] sm:$0xff] (!%p241_p2)   ;;  %v955_v25 = vld [vmem:[%s1171_s3 + $0x28] sm:$0xff] (!%p241_p2)   ;;  %v956_v33 = vld [vmem:[%s1171_s3 + $0x30] sm:$0xff] (!%p241_p2)  }
   0xa   : > { %874 = vmatprep.subr.bf16.mxu0 (!%p241_p2), %v949_v2  ;;  %932 = vmatpush3.bf16.msra.mxu1 (!%p241_p2), %v950_v3  ;;  %v957_v34 = vld [vmem:[%s1171_s3 + $0x38] sm:$0xff] (!%p241_p2)   ;;  %v822_v35 = vld [vmem:[%s1170_s2] ss:$0 sm:$0xff] (!%p241_p2) }
   0xb   : > { %925 = vmatprep.subr.bf16.mxu1 (!%p241_p2), %v951_v4 }
   0xd   : > { %875 = vmatpush3.bf16.msra.mxu0 (!%p241_p2), %v949_v2 }
   0xe   : > { %892 = vmatprep.subr.bf16.mxu0 (!%p241_p2), %v950_v3  ;;  %933 = vmatpush3.bf16.msra.mxu1 (!%p241_p2), %v951_v4 }
   0xf   : > { %s1177_s6 = smov (!%p273_p3, %s818_s6), 31  ;;  %926 = vmatprep.subr.bf16.mxu1 %v952_v5 }
  0x10   : > { %s819_s13 = sshll.u32 %s1177_s6, 3 }
  0x11   : > { %s1037_s16 = scalar_lea.vmem %s1168_s0, %s819_s13 }
  0x12   : > { %v285_v6 = vld [vmem:[%s1037_s16] sm:$0xff]  ;;  %v286_v7 = vld [vmem:[%s1037_s16 + $0x8] sm:$0xff]  ;;  %v287_v8 = vld [vmem:[%s1037_s16 + $0x10] sm:$0xff]  ;;  %934 = vmatpush3.bf16.msra.mxu1 %v952_v5 }
  0x13   : > { %v301_v9 = vpack.c.bf16 %v286_v7, %v285_v6  ;;  %v288_v10 = vld [vmem:[%s1037_s16 + $0x18] sm:$0xff]  ;;  %v289_v11 = vld [vmem:[%s1037_s16 + $0x20] sm:$0xff]  ;;  %v290_v12 = vld [vmem:[%s1037_s16 + $0x28] sm:$0xff]  ;;  %927 = vmatprep.subr.bf16.mxu1 %v953_v17 }
  0x14   : > { %v302_v13 = vpack.c.bf16 %v288_v10, %v287_v8  ;;  %v303_v14 = vpack.c.bf16 %v290_v12, %v289_v11  ;;  %v291_v15 = vld [vmem:[%s1037_s16 + $0x30] sm:$0xff]  ;;  %v292_v16 = vld [vmem:[%s1037_s16 + $0x38] sm:$0xff]  ;;  %v293_v18 = vld [vmem:[%s1037_s16 + $0x40] sm:$0xff] }
  0x15   : > { %876 = vmatprep.mubr.msk.bf16.mxu0 %vm332_vm0, %v301_v9  ;;  %v294_v19 = vld [vmem:[%s1037_s16 + $0x48] sm:$0xff]  ;;  %v304_v20 = vpack.c.bf16 %v292_v16, %v291_v15  ;;  %v295_v23 = vld [vmem:[%s1037_s16 + $0x50] sm:$0xff]  ;;  %v296_v24 = vld [vmem:[%s1037_s16 + $0x58] sm:$0xff] }
  0x16   : > { %877 = vmatmul.mubr.msk.bf16.vlgmr.msra.gmra.mrb[0].mxu0 %vm332_vm0, %v302_v13  ;;  %v305_v21 = vpack.c.bf16 %v294_v19, %v293_v18  ;;  %935 = vmatpush3.bf16.msra.mxu1 %v953_v17  ;;  %v297_v26 = vld [vmem:[%s1037_s16 + $0x60] sm:$0xff]  ;;  %v298_v27 = vld [vmem:[%s1037_s16 + $0x68] sm:$0xff]  ;;  %v306_v28 = vpack.c.bf16 %v296_v24, %v295_v23  ;;  %v299_v30 = vld [vmem:[%s1037_s16 + $0x70] sm:$0xff] }
  0x17   : > { %880 = vmatprep.mubr.msk.bf16.mxu0 %vm332_vm0, %v303_v14  ;;  %893 = vmatpush3.bf16.msra.mxu0 %v950_v3  ;;  %v307_v29 = vpack.c.bf16 %v298_v27, %v297_v26  ;;  %v300_v31 = vld [vmem:[%s1037_s16 + $0x78] sm:$0xff]  ;;  %s1131_s16 = scalar_lea.vmem %s1175_s7, %s819_s13 }
  0x18   : > { %894 = vmatprep.subr.bf16.mxu0 %v951_v4  ;;  %928 = vmatprep.subr.bf16.mxu1 %v954_v22  ;;  %v308_v32 = vpack.c.bf16 %v300_v31, %v299_v30 }
  0x1a   : > { %936 = vmatpush3.bf16.msra.mxu1 %v954_v22 }
  0x1b   : > { %895 = vmatpush3.bf16.msra.mxu0 %v951_v4  ;;  %929 = vmatprep.subr.bf16.mxu1 %v955_v25 }
  0x1c   : > { %896 = vmatprep.subr.bf16.mxu0 %v952_v5 }
  0x1e   : > { %881 = vmatmul.mubr.msk.bf16.gmra.mrb[4].mxu0 %vm332_vm0, %v304_v20  ;;  %937 = vmatpush3.bf16.msra.mxu1 %v955_v25 }
  0x1f   : > { %884 = vmatprep.mubr.msk.bf16.mxu0 %vm332_vm0, %v305_v21  ;;  %897 = vmatpush3.bf16.msra.mxu0 %v952_v5 }
  0x20   : > { %898 = vmatprep.subr.bf16.mxu0 %v953_v17  ;;  %930 = vmatprep.subr.bf16.mxu1 %v956_v33 }
  0x22   : > { %938 = vmatpush3.bf16.msra.mxu1 %v956_v33 }
  0x23   : > { %899 = vmatpush3.bf16.msra.mxu0 %v953_v17  ;;  %931 = vmatprep.subr.bf16.mxu1 %v957_v34 }
  0x24   : > { %900 = vmatprep.subr.bf16.mxu0 %v954_v22 }
  0x26   : > { %885 = vmatmul.mubr.msk.bf16.gmra.mrb[8].mxu0 %vm332_vm0, %v306_v28  ;;  %939 = vmatpush3.bf16.msra.mxu1 %v957_v34  ;;  %v1087_v28 = vld [vmem:[%s1172_s4] ss:$0 sm:$0xff] }
  0x27   : > { %888 = vmatprep.mubr.msk.bf16.mxu0 %vm332_vm0, %v307_v29  ;;  %901 = vmatpush3.bf16.msra.mxu0 %v954_v22 }
  0x28   : > { %902 = vmatprep.subr.bf16.mxu0 %v955_v25 }
  0x2b   : > { %903 = vmatpush3.bf16.msra.mxu0 %v955_v25 }
  0x2c   : > { %904 = vmatprep.subr.bf16.mxu0 %v956_v33 }
  0x2e   : > { %889 = vmatmul.mubr.msk.bf16.gmra.mrb[12].mxu0 %vm332_vm0, %v308_v32 }
  0x2f   : > { %905 = vmatpush3.bf16.msra.mxu0 %v956_v33 }
  0x30   : > { %906 = vmatprep.subr.bf16.mxu0 %v957_v34 }
  0x33   : > { %907 = vmatpush3.bf16.msra.mxu0 %v957_v34  ;;  %v1094_v34 = vld [vmem:[%s1173_s5] ss:$0 sm:$0xff] }
  0xe9   : > { %v878_v36 = vpop.f32.mrb[0].mxu0 }
  0xea   : > { %v400_v37 = vadd.f32 %v878_v36, %v822_v35  ;;  %v391_v38 = vpop.f32.mrb[1].mxu0 }
  0xeb   : > { %v392_v39 = vadd.f32 %v822_v35, %v391_v38  ;;  %v879_v40 = vpop.f32.mrb[2].mxu0 }
  0xec   : > { %v403_v41 = vadd.f32 %v879_v40, %v822_v35  ;;  %v394_v42 = vpop.f32.mrb[3].mxu0  ;;  %v456_v44 = vmax.f32 %v400_v37, 0.0 }
  0xed   : > { %v395_v43 = vadd.f32 %v822_v35, %v394_v42  ;;  %v454_v46 = vmax.f32 %v392_v39, 0.0 }
  0xee   : > { %v457_v45 = vmax.f32 %v403_v41, 0.0 }
  0xef   : > { %v455_v47 = vmax.f32 %v395_v43, 0.0 }
  0xf0   : > { %v471_v48 = vpack.c.bf16 %v457_v45, %v456_v44 }
  0xf1   : > { %v470_v49 = vpack.c.bf16 %v455_v47, %v454_v46  ;;  %v882_v50 = vpop.f32.mrb[4].mxu0 }
  0xf2   : > { %v416_v51 = vadd.f32 %v882_v50, %v822_v35  ;;  %v407_v52 = vpop.f32.mrb[5].mxu0 }
  0xf3   : > { %v408_v53 = vadd.f32 %v822_v35, %v407_v52  ;;  %v883_v54 = vpop.f32.mrb[6].mxu0  ;;  %908 = vmatprep.mubr.bf16.mxu0 %v470_v49 }
  0xf4   : > { %v419_v55 = vadd.f32 %v883_v54, %v822_v35  ;;  %v410_v56 = vpop.f32.mrb[7].mxu0  ;;  %909 = vmatmul.mubr.bf16.vlgmr.msra.gmra.mrb[16].mxu0 %v471_v48  ;;  %v460_v58 = vmax.f32 %v416_v51, 0.0 }
  0xf5   : > { %v411_v57 = vadd.f32 %v822_v35, %v410_v56  ;;  %v458_v60 = vmax.f32 %v408_v53, 0.0 }
  0xf6   : > { %v461_v59 = vmax.f32 %v419_v55, 0.0 }
  0xf7   : > { %v459_v61 = vmax.f32 %v411_v57, 0.0 }
  0xf8   : > { %v473_v62 = vpack.c.bf16 %v461_v59, %v460_v58 }
  0xf9   : > { %v886_v63 = vpop.f32.mrb[8].mxu0  ;;  %v472_v0 = vpack.c.bf16 %v459_v61, %v458_v60 }
  0xfa   : > { %v432_v1 = vadd.f32 %v886_v63, %v822_v35  ;;  %v423_v2 = vpop.f32.mrb[9].mxu0 }
  0xfb   : > { %v424_v3 = vadd.f32 %v822_v35, %v423_v2  ;;  %v887_v4 = vpop.f32.mrb[10].mxu0  ;;  %912 = vmatprep.mubr.bf16.mxu1 %v472_v0 }
  0xfc   : > { %v435_v5 = vadd.f32 %v887_v4, %v822_v35  ;;  %v426_v6 = vpop.f32.mrb[11].mxu0  ;;  %913 = vmatmul.mubr.bf16.vlgmr.msra.gmra.mrb[0].mxu1 %v473_v62  ;;  %v464_v8 = vmax.f32 %v432_v1, 0.0 }
  0xfd   : > { %v427_v7 = vadd.f32 %v822_v35, %v426_v6  ;;  %v462_v10 = vmax.f32 %v424_v3, 0.0 }
  0xfe   : > { %v465_v9 = vmax.f32 %v435_v5, 0.0 }
  0xff   : > { %v463_v11 = vmax.f32 %v427_v7, 0.0 }
 0x100   : > { %v475_v12 = vpack.c.bf16 %v465_v9, %v464_v8 }
 0x101   : > { %v474_v13 = vpack.c.bf16 %v463_v11, %v462_v10  ;;  %v890_v14 = vpop.f32.mrb[12].mxu0 }
 0x102   : > { %v448_v15 = vadd.f32 %v890_v14, %v822_v35  ;;  %v439_v16 = vpop.f32.mrb[13].mxu0 }
 0x103   : > { %v440_v17 = vadd.f32 %v822_v35, %v439_v16  ;;  %v891_v18 = vpop.f32.mrb[14].mxu0  ;;  %916 = vmatprep.mubr.bf16.mxu1 %v474_v13 }
 0x104   : > { %v451_v19 = vadd.f32 %v891_v18, %v822_v35  ;;  %v442_v20 = vpop.f32.mrb[15].mxu0  ;;  %917 = vmatmul.mubr.bf16.gmra.mrb[4].mxu1 %v475_v12  ;;  %v468_v22 = vmax.f32 %v448_v15, 0.0 }
 0x105   : > { %v443_v21 = vadd.f32 %v822_v35, %v442_v20  ;;  %v466_v24 = vmax.f32 %v440_v17, 0.0 }
 0x106   : > { %v469_v23 = vmax.f32 %v451_v19, 0.0 }
 0x107   : > { %v467_v25 = vmax.f32 %v443_v21, 0.0 }
 0x108   : > { %v477_v26 = vpack.c.bf16 %v469_v23, %v468_v22 }
 0x109   : > { %v476_v27 = vpack.c.bf16 %v467_v25, %v466_v24 }
 0x10b   : > { %920 = vmatprep.mubr.bf16.mxu1 %v476_v27 }
 0x10c   : > { %921 = vmatmul.mubr.bf16.gmra.mrb[8].mxu1 %v477_v26 }
 0x1c7   : > { %v910_v29 = vpop.f32.mrb[16].mxu0 }
 0x1c8   : > { %v592_v30 = vadd.f32 %v910_v29, %v1087_v28  ;;  %v583_v31 = vpop.f32.mrb[17].mxu0 }
 0x1c9   : > { %v584_v32 = vadd.f32 %v1087_v28, %v583_v31  ;;  %v911_v33 = vpop.f32.mrb[18].mxu0  ;;  %v843_v31 = vld [vmem:[#allocation2] ss:$0 sm:$0xff] }
 0x1ca   : > { %v648_v35 = vmax.f32 %v592_v30, 0.0  ;;  %v595_v36 = vadd.f32 %v911_v33, %v1087_v28  ;;  %v586_v37 = vpop.f32.mrb[19].mxu0 }
 0x1cb   : > { %v646_v38 = vmax.f32 %v584_v32, 0.0  ;;  %v587_v39 = vadd.f32 %v1087_v28, %v586_v37 }
 0x1cc   : > { %v649_v40 = vmax.f32 %v595_v36, 0.0  ;;  %v671_v41 = vmul.f32 %v1094_v34, %v648_v35 }
 0x1cd   : > { %v647_v42 = vmax.f32 %v587_v39, 0.0  ;;  %v669_v43 = vmul.f32 %v1094_v34, %v646_v38 }
 0x1ce   : > { %689 = vadd.xlane.f32.xlu1 %v671_v41  ;;  %v672_v47 = vmul.f32 %v1094_v34, %v649_v40 }
 0x1cf   : > { %v914_v44 = vpop.f32.mrb[0].mxu1  ;;  %685 = vadd.xlane.f32.xlu0 %v669_v43  ;;  %v670_v50 = vmul.f32 %v1094_v34, %v647_v42 }
 0x1d0   : > { %v608_v45 = vadd.f32 %v914_v44, %v1087_v28  ;;  %v599_v46 = vpop.f32.mrb[1].mxu1 }
 0x1d1   : > { %v600_v48 = vadd.f32 %v1087_v28, %v599_v46  ;;  %v915_v49 = vpop.f32.mrb[2].mxu1 }
 0x1d2   : > { %v652_v51 = vmax.f32 %v608_v45, 0.0  ;;  %v611_v52 = vadd.f32 %v915_v49, %v1087_v28  ;;  %v602_v53 = vpop.f32.mrb[3].mxu1  ;;  %691 = vadd.xlane.f32.xlu1 %v672_v47 }
 0x1d3   : > { %v603_v54 = vadd.f32 %v1087_v28, %v602_v53  ;;  %687 = vadd.xlane.f32.xlu0 %v670_v50  ;;  %v650_v57 = vmax.f32 %v600_v48, 0.0 }
 0x1d4   : > { %v653_v55 = vmax.f32 %v611_v52, 0.0  ;;  %v675_v56 = vmul.f32 %v1094_v34, %v652_v51 }
 0x1d5   : > { %v651_v58 = vmax.f32 %v603_v54, 0.0  ;;  %v673_v1 = vmul.f32 %v1094_v34, %v650_v57 }
 0x1d6   : > { %v676_v59 = vmul.f32 %v1094_v34, %v653_v55 }
 0x1d7   : > { %v918_v60 = vpop.f32.mrb[4].mxu1  ;;  %697 = vadd.xlane.f32.xlu0 %v675_v56  ;;  %v674_v5 = vmul.f32 %v1094_v34, %v651_v58 }
 0x1d8   : > { %v624_v61 = vadd.f32 %v918_v60, %v1087_v28  ;;  %v615_v62 = vpop.f32.mrb[5].mxu1  ;;  %699 = vadd.xlane.f32.xlu1 %v676_v59 }
 0x1d9   : > { %v616_v63 = vadd.f32 %v1087_v28, %v615_v62  ;;  %v919_v0 = vpop.f32.mrb[6].mxu1 }
 0x1da   : > { %v656_v2 = vmax.f32 %v624_v61, 0.0  ;;  %v627_v3 = vadd.f32 %v919_v0, %v1087_v28  ;;  %v618_v4 = vpop.f32.mrb[7].mxu1 }
 0x1db   : > { %v619_v6 = vadd.f32 %v1087_v28, %v618_v4  ;;  %693 = vadd.xlane.f32.xlu0 %v673_v1  ;;  %v654_v9 = vmax.f32 %v616_v63, 0.0 }
 0x1dc   : > { %v657_v7 = vmax.f32 %v627_v3, 0.0  ;;  %695 = vadd.xlane.f32.xlu1 %v674_v5  ;;  %v679_v8 = vmul.f32 %v1094_v34, %v656_v2 }
 0x1dd   : > { %v655_v10 = vmax.f32 %v619_v6, 0.0  ;;  %v677_v17 = vmul.f32 %v1094_v34, %v654_v9 }
 0x1de   : > { %v680_v11 = vmul.f32 %v1094_v34, %v657_v7 }
 0x1df   : > { %v922_v12 = vpop.f32.mrb[8].mxu1  ;;  %705 = vadd.xlane.f32.xlu0 %v679_v8  ;;  %v678_v19 = vmul.f32 %v1094_v34, %v655_v10 }
 0x1e0   : > { %v631_v13 = vpop.f32.mrb[9].mxu1  ;;  %707 = vadd.xlane.f32.xlu1 %v680_v11  ;;  %v640_v14 = vadd.f32 %v922_v12, %v1087_v28 }
 0x1e1   : > { %v632_v15 = vadd.f32 %v1087_v28, %v631_v13  ;;  %v923_v16 = vpop.f32.mrb[10].mxu1 }
 0x1e2   : > { %v634_v18 = vpop.f32.mrb[11].mxu1  ;;  %v643_v21 = vadd.f32 %v923_v16, %v1087_v28  ;;  %v660_v23 = vmax.f32 %v640_v14, 0.0 }
 0x1e3   : > { %v658_v20 = vmax.f32 %v632_v15, 0.0  ;;  %v635_v22 = vadd.f32 %v1087_v28, %v634_v18  ;;  %701 = vadd.xlane.f32.xlu0 %v677_v17 }
 0x1e4   : > { %703 = vadd.xlane.f32.xlu1 %v678_v19  ;;  %v661_v26 = vmax.f32 %v643_v21, 0.0  ;;  %v683_v29 = vmul.f32 %v1094_v34, %v660_v23 }
 0x1e5   : > { %v659_v24 = vmax.f32 %v635_v22, 0.0  ;;  %v681_v25 = vmul.f32 %v1094_v34, %v658_v20 }
 0x1e6   : > { %v684_v30 = vmul.f32 %v1094_v34, %v661_v26 }
 0x1e7   : > { %709 = vadd.xlane.f32.xlu0 %v681_v25  ;;  %v682_v27 = vmul.f32 %v1094_v34, %v659_v24 }
 0x1e9   : > { %711 = vadd.xlane.f32.xlu1 %v682_v27 }
 0x1eb   : > { %713 = vadd.xlane.f32.xlu0 %v683_v29 }
 0x1ed   : > { %715 = vadd.xlane.f32.xlu1 %v684_v30 }
 0x25b   : > { %v690_v28 = vpop.xlane.xlu1 %689 }
 0x25c   : > { %v726_v32 = vadd.f32 %v843_v31, %v690_v28  ;;  %v686_v33 = vpop.xlane.xlu0 %685 }
 0x25d   : > { %v724_v35 = vadd.f32 %v843_v31, %v686_v33 }
 0x25e   : > { %743 = vst.msk [vmem:[%s1131_s16 + $0x10] sm:$0xff] %vm740_vm1, %v726_v32 }
 0x25f   : > { %741 = vst.msk [vmem:[%s1131_s16] sm:$0xff] %vm740_vm1, %v724_v35  ;;  %v692_v34 = vpop.xlane.xlu1 %691 }
 0x260   : > { %v727_v36 = vadd.f32 %v843_v31, %v692_v34  ;;  %v688_v37 = vpop.xlane.xlu0 %687 }
 0x261   : > { %v725_v38 = vadd.f32 %v843_v31, %v688_v37 }
 0x262   : > { %744 = vst.msk [vmem:[%s1131_s16 + $0x18] sm:$0xff] %vm740_vm1, %v727_v36 }
 0x263   : > { %742 = vst.msk [vmem:[%s1131_s16 + $0x8] sm:$0xff] %vm740_vm1, %v725_v38 }
 0x264   : > { %v698_v39 = vpop.xlane.xlu0 %697 }
 0x265   : > { %v730_v40 = vadd.f32 %v843_v31, %v698_v39  ;;  %v700_v41 = vpop.xlane.xlu1 %699 }
 0x266   : > { %v731_v42 = vadd.f32 %v843_v31, %v700_v41 }
 0x267   : > { %747 = vst.msk [vmem:[%s1131_s16 + $0x30] sm:$0xff] %vm740_vm1, %v730_v40 }
 0x268   : > { %748 = vst.msk [vmem:[%s1131_s16 + $0x38] sm:$0xff] %vm740_vm1, %v731_v42  ;;  %v694_v43 = vpop.xlane.xlu0 %693 }
 0x269   : > { %v728_v44 = vadd.f32 %v843_v31, %v694_v43  ;;  %v696_v45 = vpop.xlane.xlu1 %695 }
 0x26a   : > { %v729_v46 = vadd.f32 %v843_v31, %v696_v45 }
 0x26b   : > { %745 = vst.msk [vmem:[%s1131_s16 + $0x20] sm:$0xff] %vm740_vm1, %v728_v44 }
 0x26c   : > { %746 = vst.msk [vmem:[%s1131_s16 + $0x28] sm:$0xff] %vm740_vm1, %v729_v46  ;;  %v706_v47 = vpop.xlane.xlu0 %705 }
 0x26d   : > { %v734_v48 = vadd.f32 %v843_v31, %v706_v47  ;;  %v708_v49 = vpop.xlane.xlu1 %707 }
 0x26e   : > { %v735_v50 = vadd.f32 %v843_v31, %v708_v49 }
 0x26f   : > { %751 = vst.msk [vmem:[%s1131_s16 + $0x50] sm:$0xff] %vm740_vm1, %v734_v48 }
 0x270   : > { %752 = vst.msk [vmem:[%s1131_s16 + $0x58] sm:$0xff] %vm740_vm1, %v735_v50  ;;  %v702_v51 = vpop.xlane.xlu0 %701 }
 0x271   : > { %v732_v52 = vadd.f32 %v843_v31, %v702_v51  ;;  %v704_v53 = vpop.xlane.xlu1 %703 }
 0x272   : > { %v733_v54 = vadd.f32 %v843_v31, %v704_v53 }
 0x273   : > { %749 = vst.msk [vmem:[%s1131_s16 + $0x40] sm:$0xff] %vm740_vm1, %v732_v52 }
 0x274   : > { %750 = vst.msk [vmem:[%s1131_s16 + $0x48] sm:$0xff] %vm740_vm1, %v733_v54  ;;  %v710_v55 = vpop.xlane.xlu0 %709 }
 0x275   : > { %v736_v56 = vadd.f32 %v843_v31, %v710_v55 }
 0x276   : > { %v712_v57 = vpop.xlane.xlu1 %711 }
 0x277   : > { %753 = vst.msk [vmem:[%s1131_s16 + $0x60] sm:$0xff] %vm740_vm1, %v736_v56  ;;  %v737_v58 = vadd.f32 %v843_v31, %v712_v57 }
 0x278   : > { %v714_v59 = vpop.xlane.xlu0 %713 }
 0x279   : > { %754 = vst.msk [vmem:[%s1131_s16 + $0x68] sm:$0xff] %vm740_vm1, %v737_v58  ;;  %v738_v60 = vadd.f32 %v843_v31, %v714_v59 }
 0x27a   : > { %v716_v61 = vpop.xlane.xlu1 %715 }
 0x27b   : > { %755 = vst.msk [vmem:[%s1131_s16 + $0x70] sm:$0xff] %vm740_vm1, %v738_v60  ;;  %v739_v62 = vadd.f32 %v843_v31, %v716_v61 }
 0x27d   : > { %756 = vst.msk [vmem:[%s1131_s16 + $0x78] sm:$0xff] %vm740_vm1, %v739_v62 }
 0x27e PF: > { %s19_s26 = sadd.s32 1, %s964_s26  }
 0x27f   : > { %p16_p4 = scmp.ge.s32.totalorder %s19_s26, 4  }
 0x281   :  { %18 = sbr.rel (!%p16_p4) target bundleno = 3 (0x3), region = 78 }

</bundles_post_ra>
